<compile_context>
chip_gen: v7x
topology: tpu7x:2x2x1
jax: 0.10.0
libtpu: 0.0.40
codegen_flags: <defaults>
</compile_context>

<pallas_src>
import functools

import jax
import jax.numpy as jnp
import numpy as np
from jax import lax
from jax.experimental import pallas as pl
from jax.experimental.pallas import tpu as pltpu


def _chamfer_knn_kernel(adv_ref, ori_ref, out_ref, *, k, alpha, w1, w2, K, Bt):
    f32 = jnp.float32
    big = f32(1e30)
    inv_k = f32(1.0 / k)

    # (K, K) diagonal mask, built once per grid step (3 ops x 16 vregs @ K=128).
    row_ids = lax.broadcasted_iota(jnp.int32, (K, K), 0)
    col_ids = lax.broadcasted_iota(jnp.int32, (K, K), 1)
    diag = row_ids == col_ids

    # Lane indices used to scatter the per-cloud scalar losses into one
    # lane-dense (1, Bt) row that is stored exactly once.
    lane_ids = lax.broadcasted_iota(jnp.int32, (1, Bt), 1)
    out_row = jnp.zeros((1, Bt), f32)

    # Static per-cloud loop: at K=128 the (K, K) slabs (16 vregs each) stay
    # register-resident through the whole k-extraction instead of streaming a
    # (Bt, K, K) buffer through VMEM every pass.
    for b in range(Bt):
        adv = adv_ref[b]                                   # (K, 3)
        ori = ori_ref[b]                                   # (K, 3)

        # Column-form squared norms (3-wide lane reduce, cheap).
        adv_sq_col = jnp.sum(adv * adv, axis=1, keepdims=True)   # (K, 1)
        ori_sq_col = jnp.sum(ori * ori, axis=1, keepdims=True)   # (K, 1)

        # Gram matrices via the canonical minor-dim contraction (MXU):
        #   G[j, i] = <adv_j, adv_i>   (neighbours j on sublanes, queries i on lanes)
        #   S[o, a] = <ori_o, adv_a>   (ori points o on sublanes, adv points a on lanes)
        G = jnp.einsum('jd,id->ji', adv, adv, preferred_element_type=jnp.float32)
        S = jnp.einsum('od,ad->oa', ori, adv, preferred_element_type=jnp.float32)

        # Row-form adv squared norm from the Gram diagonal (select + sublane
        # reduce); avoids a (1,K)->(K,1)/(K,1)->(1,K) relayout.
        adv_sq_row = jnp.sum(jnp.where(diag, G, 0.0), axis=0, keepdims=True)  # (1, K)

        # ---------------- Chamfer (adv2ori) ----------------
        # mean_a min_o ||ori_o - adv_a||^2; the per-a constant adv_sq[a]
        # commutes with min_o and is added afterwards.  Sublane min (VPU tree
        # + one 8-wide XLU reduce), then one cross-lane mean per cloud.
        rowmin = jnp.min(ori_sq_col - 2.0 * S, axis=0, keepdims=True)        # (1, K)
        chamfer_b = jnp.mean(rowmin + adv_sq_row, axis=1, keepdims=True)     # (1, 1)

        # ---------------- kNN distance loss on adv ----------------
        # D[i, j] = adv_sq[i] + adv_sq[j] - 2 G[i, j]; the per-i constant
        # commutes with the k-smallest selection over j.  Neighbours j live on
        # sublanes, so every extract-min is sublane-oriented.
        work = jnp.where(diag, big, adv_sq_col - 2.0 * G)                    # (K_j, K_i)
        acc = jnp.zeros((1, K), f32)
        for step in range(k):                                                # k = 5, unrolled
            m = jnp.min(work, axis=0, keepdims=True)                         # (1, K)
            acc = acc + m
            if step + 1 < k:
                # NOTE: exact ties (exactly duplicated points) are masked
                # together, unlike torch.topk which counts them repeatedly.
                work = jnp.where(work == m, big, work)

        value = adv_sq_row + acc * inv_k                                     # (1, K)
        mean = jnp.mean(value, axis=1, keepdims=True)                        # (1, 1)
        # torch.std default is unbiased (ddof = 1).
        var = jnp.sum((value - mean) ** 2, axis=1, keepdims=True) * f32(1.0 / (K - 1))
        thr = mean + f32(alpha) * jnp.sqrt(var)
        mask = (value > thr).astype(f32)
        knn_b = jnp.mean(value * mask, axis=1, keepdims=True)                # (1, 1)

        loss_b = f32(w1) * chamfer_b + f32(w2) * knn_b                       # (1, 1)
        out_row = jnp.where(lane_ids == b, loss_b, out_row)

    out_ref[...] = out_row.reshape(1, 1, Bt)


def chamfer_knn_dist(adv_pc, ori_pc, weights=None, batch_avg=True, *,
                     knn_k=5, knn_alpha=1.05, chamfer_weight=5.0,
                     knn_weight=3.0, batch_tile=8):
    """ChamferkNNDist forward (chamfer_method='adv2ori').

    adv_pc, ori_pc: [B, K, 3] float32.
    """
    adv_pc = adv_pc.astype(jnp.float32)
    ori_pc = ori_pc.astype(jnp.float32)
    B, K, D = adv_pc.shape
    assert D == 3, "point clouds must be [B, K, 3]"
    assert K > knn_k + 1 and K >= 2, "need more points than kNN neighbours"

    # Batch tile: a divisor of B (no host-side padding / concatenate), capped
    # so the grid has >= 2 blocks whenever B >= 2 (both v7x TCs get work).
    # Raise batch_tile toward 16-32 on v6e (128 MiB VMEM); keep 8-16 on v5e.
    cap = max(1, min(batch_tile, -(-B // 2)))
    Bt = max(d for d in range(1, cap + 1) if B % d == 0)
    num_blocks = B // Bt

    kernel = functools.partial(_chamfer_knn_kernel, k=knn_k, alpha=knn_alpha,
                               w1=chamfer_weight, w2=knn_weight, K=K, Bt=Bt)

    # VMEM budget: double-buffered inputs (3 lanes padded to 128) plus the
    # per-cloud (K, K) intermediates; clamp to [32 MiB, 64 MiB] (v7x physical).
    in_bytes = 2 * 2 * Bt * K * 128 * 4
    tmp_bytes = Bt * 4 * K * max(K, 128) * 4
    vmem_limit = int(min(64 * 2**20, max(32 * 2**20, 2 * (in_bytes + tmp_bytes))))

    flops = int(B * K * K * (4 * 3 + 3 * knn_k + 10))
    bytes_accessed = int(B * (2 * K * 3 + 1) * 4)

    per_block = pl.pallas_call(
        kernel,
        out_shape=jax.ShapeDtypeStruct((num_blocks, 1, Bt), jnp.float32),
        grid_spec=pltpu.PrefetchScalarGridSpec(
            num_scalar_prefetch=0,
            grid=(num_blocks,),
            in_specs=[
                pl.BlockSpec((Bt, K, 3), lambda b: (b, 0, 0)),
                pl.BlockSpec((Bt, K, 3), lambda b: (b, 0, 0)),
            ],
            out_specs=pl.BlockSpec((1, 1, Bt), lambda b: (b, 0, 0)),
        ),
        compiler_params=pltpu.CompilerParams(
            dimension_semantics=("parallel",),
            vmem_limit_bytes=vmem_limit),
        cost_estimate=pl.CostEstimate(flops=flops, transcendentals=0,
                                      bytes_accessed=bytes_accessed),
    )(adv_pc, ori_pc)

    per_batch = per_block.reshape(B)
    if weights is None:
        weights = jnp.ones((B,), jnp.float32)
    loss = per_batch * weights.astype(jnp.float32)
    if batch_avg:
        return jnp.mean(loss)
    return loss


def _reference(adv, ori, *, k=5, alpha=1.05, w1=5.0, w2=3.0):
    """Pure-JAX reference mirroring the PyTorch module (weights=None, batch_avg=True)."""
    # Chamfer adv2ori: mean over adv points of min over ori points.
    P = jnp.sum((ori[:, :, None, :] - adv[:, None, :, :]) ** 2, axis=-1)
    loss1 = jnp.mean(jnp.min(P, axis=1), axis=1)                      # [B]
    # kNN loss on adv.
    Dm = jnp.sum((adv[:, :, None, :] - adv[:, None, :, :]) ** 2, axis=-1)
    neg_val, _ = lax.top_k(-Dm, k + 1)
    value = jnp.mean(-neg_val[..., 1:], axis=-1)                      # [B, K]
    mean = jnp.mean(value, axis=-1)
    std = jnp.std(value, axis=-1, ddof=1)
    thr = mean + alpha * std
    mask = (value > thr[:, None]).astype(jnp.float32)
    knn = jnp.mean(value * mask, axis=1)
    return jnp.mean(loss1 * w1 + knn * w2)


if __name__ == "__main__":
    key = jax.random.PRNGKey(0)
    k1, k2 = jax.random.split(key)
    B, K = 2, 128
    adv_pc = jax.random.normal(k1, (B, K, 3), dtype=jnp.float32)
    ori_pc = adv_pc + 0.05 * jax.random.normal(k2, (B, K, 3), dtype=jnp.float32)

    out = chamfer_knn_dist(adv_pc, ori_pc)
    out = jax.block_until_ready(out)

    ref = _reference(adv_pc, ori_pc)
    np.testing.assert_allclose(np.asarray(out), np.asarray(ref),
                               rtol=1e-3, atol=2e-4)
    print("KERNEL_OK")
</pallas_src>

<mosaic_0001>
module attributes {stable_mosaic.version = 11 : i64} {
  func.func @_chamfer_knn_kernel(%arg0: i32, %arg1: memref<1x128x3xf32, #tpu.memory_space<vmem>>, %arg2: memref<1x128x3xf32, #tpu.memory_space<vmem>>, %arg3: memref<1x1x1xf32, #tpu.memory_space<vmem>>) attributes {dimension_semantics = [#tpu.dimension_semantics<parallel>], iteration_bounds = array<i64: 2>, scalar_prefetch = 0 : i64, scratch_operands = 0 : i64, tpu.core_type = #tpu.core_type<tc>, window_params = [{transform_indices = @transform_0, window_bounds = array<i64: 1, 128, 3>}, {transform_indices = @transform_1, window_bounds = array<i64: 1, 128, 3>}, {transform_indices = @transform_2, window_bounds = array<i64: 1, 1, 1>}]} {
    %0 = tpu.iota {dimensions = array<i32: 0>} : vector<128x128xi32>
    %1 = tpu.iota {dimensions = array<i32: 1>} : vector<128x128xi32>
    %2 = arith.cmpi eq, %0, %1 : vector<128x128xi32>
    %3 = tpu.iota {dimensions = array<i32: 1>} : vector<1x1xi32>
    %cst = arith.constant 0.000000e+00 : f32
    %4 = vector.broadcast %cst : f32 to vector<1x1xf32>
    %c0 = arith.constant 0 : index
    %c0_0 = arith.constant 0 : index
    %c0_1 = arith.constant 0 : index
    %5 = vector.load %arg1[%c0, %c0_0, %c0_1] : memref<1x128x3xf32, #tpu.memory_space<vmem>>, vector<1x128x3xf32>
    %6 = vector.shape_cast %5 : vector<1x128x3xf32> to vector<128x3xf32>
    %c0_2 = arith.constant 0 : index
    %c0_3 = arith.constant 0 : index
    %c0_4 = arith.constant 0 : index
    %7 = vector.load %arg2[%c0_2, %c0_3, %c0_4] : memref<1x128x3xf32, #tpu.memory_space<vmem>>, vector<1x128x3xf32>
    %8 = vector.shape_cast %7 : vector<1x128x3xf32> to vector<128x3xf32>
    %9 = arith.mulf %6, %6 : vector<128x3xf32>
    %cst_5 = arith.constant dense<0.000000e+00> : vector<128xf32>
    %10 = vector.multi_reduction <add>, %9, %cst_5 [1] : vector<128x3xf32> to vector<128xf32>
    %11 = vector.shape_cast %10 : vector<128xf32> to vector<128x1xf32>
    %12 = arith.mulf %8, %8 : vector<128x3xf32>
    %cst_6 = arith.constant dense<0.000000e+00> : vector<128xf32>
    %13 = vector.multi_reduction <add>, %12, %cst_6 [1] : vector<128x3xf32> to vector<128xf32>
    %14 = vector.shape_cast %13 : vector<128xf32> to vector<128x1xf32>
    "tpu.trace_start"() <{level = 10 : i32, message = "jd,id->ji"}> : () -> ()
    %cst_7 = arith.constant dense<0.000000e+00> : vector<128x128xf32>
    %15 = tpu.matmul %6, %6, %cst_7 {dimension_numbers = #tpu.dot_dimension_numbers<[1], [1], [0], [0], [0, 0, 1, 0], [], []>} : vector<128x3xf32>, vector<128x3xf32>, vector<128x128xf32> -> vector<128x128xf32>
    "tpu.trace_stop"() : () -> ()
    "tpu.trace_start"() <{level = 10 : i32, message = "od,ad->oa"}> : () -> ()
    %cst_8 = arith.constant dense<0.000000e+00> : vector<128x128xf32>
    %16 = tpu.matmul %8, %6, %cst_8 {dimension_numbers = #tpu.dot_dimension_numbers<[1], [1], [0], [0], [0, 0, 1, 0], [], []>} : vector<128x3xf32>, vector<128x3xf32>, vector<128x128xf32> -> vector<128x128xf32>
    %cst_9 = arith.constant 0.000000e+00 : f32
    "tpu.trace_stop"() : () -> ()
    %17 = vector.broadcast %cst_9 : f32 to vector<128x128xf32>
    %18 = arith.select %2, %15, %17 : vector<128x128xi1>, vector<128x128xf32>
    %cst_10 = arith.constant dense<0.000000e+00> : vector<128xf32>
    %19 = vector.multi_reduction <add>, %18, %cst_10 [0] : vector<128x128xf32> to vector<128xf32>
    %20 = vector.shape_cast %19 : vector<128xf32> to vector<1x128xf32>
    %cst_11 = arith.constant 2.000000e+00 : f32
    %21 = vector.broadcast %cst_11 : f32 to vector<128x128xf32>
    %22 = arith.mulf %21, %16 : vector<128x128xf32>
    %23 = vector.broadcast %14 : vector<128x1xf32> to vector<128x128xf32>
    %24 = arith.subf %23, %22 : vector<128x128xf32>
    %cst_12 = arith.constant dense<0x7F800000> : vector<128xf32>
    %25 = vector.multi_reduction <minimumf>, %24, %cst_12 [0] : vector<128x128xf32> to vector<128xf32>
    %26 = vector.shape_cast %25 : vector<128xf32> to vector<1x128xf32>
    %27 = arith.addf %26, %20 : vector<1x128xf32>
    %cst_13 = arith.constant dense<0.000000e+00> : vector<1xf32>
    %28 = vector.multi_reduction <add>, %27, %cst_13 [1] : vector<1x128xf32> to vector<1xf32>
    %29 = vector.shape_cast %28 : vector<1xf32> to vector<1x1xf32>
    %cst_14 = arith.constant 1.280000e+02 : f32
    %30 = vector.broadcast %cst_14 : f32 to vector<1x1xf32>
    %31 = arith.divf %29, %30 : vector<1x1xf32>
    %cst_15 = arith.constant 2.000000e+00 : f32
    %32 = vector.broadcast %cst_15 : f32 to vector<128x128xf32>
    %33 = arith.mulf %32, %15 : vector<128x128xf32>
    %34 = vector.broadcast %11 : vector<128x1xf32> to vector<128x128xf32>
    %35 = arith.subf %34, %33 : vector<128x128xf32>
    %cst_16 = arith.constant 1.000000e+30 : f32
    %36 = vector.broadcast %cst_16 : f32 to vector<128x128xf32>
    %37 = arith.select %2, %36, %35 : vector<128x128xi1>, vector<128x128xf32>
    %cst_17 = arith.constant 0.000000e+00 : f32
    %38 = vector.broadcast %cst_17 : f32 to vector<1x128xf32>
    %cst_18 = arith.constant dense<0x7F800000> : vector<128xf32>
    %39 = vector.multi_reduction <minimumf>, %37, %cst_18 [0] : vector<128x128xf32> to vector<128xf32>
    %40 = vector.shape_cast %39 : vector<128xf32> to vector<1x128xf32>
    %41 = arith.addf %38, %40 : vector<1x128xf32>
    %42 = vector.broadcast %40 : vector<1x128xf32> to vector<128x128xf32>
    %43 = arith.cmpf oeq, %37, %42 : vector<128x128xf32>
    %cst_19 = arith.constant 1.000000e+30 : f32
    %44 = vector.broadcast %cst_19 : f32 to vector<128x128xf32>
    %45 = arith.select %43, %44, %37 : vector<128x128xi1>, vector<128x128xf32>
    %cst_20 = arith.constant dense<0x7F800000> : vector<128xf32>
    %46 = vector.multi_reduction <minimumf>, %45, %cst_20 [0] : vector<128x128xf32> to vector<128xf32>
    %47 = vector.shape_cast %46 : vector<128xf32> to vector<1x128xf32>
    %48 = arith.addf %41, %47 : vector<1x128xf32>
    %49 = vector.broadcast %47 : vector<1x128xf32> to vector<128x128xf32>
    %50 = arith.cmpf oeq, %45, %49 : vector<128x128xf32>
    %cst_21 = arith.constant 1.000000e+30 : f32
    %51 = vector.broadcast %cst_21 : f32 to vector<128x128xf32>
    %52 = arith.select %50, %51, %45 : vector<128x128xi1>, vector<128x128xf32>
    %cst_22 = arith.constant dense<0x7F800000> : vector<128xf32>
    %53 = vector.multi_reduction <minimumf>, %52, %cst_22 [0] : vector<128x128xf32> to vector<128xf32>
    %54 = vector.shape_cast %53 : vector<128xf32> to vector<1x128xf32>
    %55 = arith.addf %48, %54 : vector<1x128xf32>
    %56 = vector.broadcast %54 : vector<1x128xf32> to vector<128x128xf32>
    %57 = arith.cmpf oeq, %52, %56 : vector<128x128xf32>
    %cst_23 = arith.constant 1.000000e+30 : f32
    %58 = vector.broadcast %cst_23 : f32 to vector<128x128xf32>
    %59 = arith.select %57, %58, %52 : vector<128x128xi1>, vector<128x128xf32>
    %cst_24 = arith.constant dense<0x7F800000> : vector<128xf32>
    %60 = vector.multi_reduction <minimumf>, %59, %cst_24 [0] : vector<128x128xf32> to vector<128xf32>
    %61 = vector.shape_cast %60 : vector<128xf32> to vector<1x128xf32>
    %62 = arith.addf %55, %61 : vector<1x128xf32>
    %63 = vector.broadcast %61 : vector<1x128xf32> to vector<128x128xf32>
    %64 = arith.cmpf oeq, %59, %63 : vector<128x128xf32>
    %cst_25 = arith.constant 1.000000e+30 : f32
    %65 = vector.broadcast %cst_25 : f32 to vector<128x128xf32>
    %66 = arith.select %64, %65, %59 : vector<128x128xi1>, vector<128x128xf32>
    %cst_26 = arith.constant dense<0x7F800000> : vector<128xf32>
    %67 = vector.multi_reduction <minimumf>, %66, %cst_26 [0] : vector<128x128xf32> to vector<128xf32>
    %68 = vector.shape_cast %67 : vector<128xf32> to vector<1x128xf32>
    %69 = arith.addf %62, %68 : vector<1x128xf32>
    %cst_27 = arith.constant 2.000000e-01 : f32
    %70 = vector.broadcast %cst_27 : f32 to vector<1x128xf32>
    %71 = arith.mulf %69, %70 : vector<1x128xf32>
    %72 = arith.addf %20, %71 : vector<1x128xf32>
    %cst_28 = arith.constant dense<0.000000e+00> : vector<1xf32>
    %73 = vector.multi_reduction <add>, %72, %cst_28 [1] : vector<1x128xf32> to vector<1xf32>
    %74 = vector.shape_cast %73 : vector<1xf32> to vector<1x1xf32>
    %cst_29 = arith.constant 1.280000e+02 : f32
    %75 = vector.broadcast %cst_29 : f32 to vector<1x1xf32>
    %76 = arith.divf %74, %75 : vector<1x1xf32>
    %77 = vector.broadcast %76 : vector<1x1xf32> to vector<1x128xf32>
    %78 = arith.subf %72, %77 : vector<1x128xf32>
    %79 = arith.mulf %78, %78 : vector<1x128xf32>
    %cst_30 = arith.constant dense<0.000000e+00> : vector<1xf32>
    %80 = vector.multi_reduction <add>, %79, %cst_30 [1] : vector<1x128xf32> to vector<1xf32>
    %81 = vector.shape_cast %80 : vector<1xf32> to vector<1x1xf32>
    %cst_31 = arith.constant 0.00787401571 : f32
    %82 = vector.broadcast %cst_31 : f32 to vector<1x1xf32>
    %83 = arith.mulf %81, %82 : vector<1x1xf32>
    %84 = math.sqrt %83 : vector<1x1xf32>
    %cst_32 = arith.constant 1.050000e+00 : f32
    %85 = vector.broadcast %cst_32 : f32 to vector<1x1xf32>
    %86 = arith.mulf %85, %84 : vector<1x1xf32>
    %87 = arith.addf %76, %86 : vector<1x1xf32>
    %88 = vector.broadcast %87 : vector<1x1xf32> to vector<1x128xf32>
    %89 = arith.cmpf ogt, %72, %88 : vector<1x128xf32>
    %90 = arith.extui %89 : vector<1x128xi1> to vector<1x128xi32>
    %91 = arith.sitofp %90 : vector<1x128xi32> to vector<1x128xf32>
    %92 = arith.mulf %72, %91 : vector<1x128xf32>
    %cst_33 = arith.constant dense<0.000000e+00> : vector<1xf32>
    %93 = vector.multi_reduction <add>, %92, %cst_33 [1] : vector<1x128xf32> to vector<1xf32>
    %94 = vector.shape_cast %93 : vector<1xf32> to vector<1x1xf32>
    %cst_34 = arith.constant 1.280000e+02 : f32
    %95 = vector.broadcast %cst_34 : f32 to vector<1x1xf32>
    %96 = arith.divf %94, %95 : vector<1x1xf32>
    %cst_35 = arith.constant 5.000000e+00 : f32
    %97 = vector.broadcast %cst_35 : f32 to vector<1x1xf32>
    %98 = arith.mulf %97, %31 : vector<1x1xf32>
    %cst_36 = arith.constant 3.000000e+00 : f32
    %99 = vector.broadcast %cst_36 : f32 to vector<1x1xf32>
    %100 = arith.mulf %99, %96 : vector<1x1xf32>
    %101 = arith.addf %98, %100 : vector<1x1xf32>
    %c0_i32 = arith.constant 0 : i32
    %102 = vector.broadcast %c0_i32 : i32 to vector<1x1xi32>
    %103 = arith.cmpi eq, %3, %102 : vector<1x1xi32>
    %104 = arith.select %103, %101, %4 : vector<1x1xi1>, vector<1x1xf32>
    %105 = vector.shape_cast %104 : vector<1x1xf32> to vector<1x1x1xf32>
    %c0_37 = arith.constant 0 : index
    %c0_38 = arith.constant 0 : index
    %c0_39 = arith.constant 0 : index
    %106 = vector.load %arg3[%c0_37, %c0_38, %c0_39] : memref<1x1x1xf32, #tpu.memory_space<vmem>>, vector<1x1x1xf32>
    tpu.vector_store %arg3[%c0_37, %c0_38, %c0_39], %105 {strides = array<i32>} : memref<1x1x1xf32, #tpu.memory_space<vmem>>, vector<1x1x1xf32>,
    return
  }
  func.func @transform_0(%arg0: i32) -> (i32, i32, i32) {
    %c0_i32 = arith.constant 0 : i32
    %c0_i32_0 = arith.constant 0 : i32
    %c0_i32_1 = arith.constant 0 : i32
    return %arg0, %c0_i32, %c0_i32_0 : i32, i32, i32
  }
  func.func @transform_1(%arg0: i32) -> (i32, i32, i32) {
    %c0_i32 = arith.constant 0 : i32
    %c0_i32_0 = arith.constant 0 : i32
    %c0_i32_1 = arith.constant 0 : i32
    return %arg0, %c0_i32, %c0_i32_0 : i32, i32, i32
  }
  func.func @transform_2(%arg0: i32) -> (i32, i32, i32) {
    %c0_i32 = arith.constant 0 : i32
    %c0_i32_0 = arith.constant 0 : i32
    %c0_i32_1 = arith.constant 0 : i32
    return %arg0, %c0_i32, %c0_i32_0 : i32, i32, i32
  }
}

</mosaic_0001>

<bundles_post_ra>
// kernel: tpu_custom_call.1
= control target key start
LH: loop header
LB: loop body
LE: loop exit
PB: predicated region body
PF: predicated region fallthrough
CT: control target
= control target key end

     0   :  { %s1600_s9 = smov 0   ;;  %s2344_s0 = inlined_call_operand.vmem [shape: f32[2,128,3], index: 0, kind: input, shape index: {}]   ;;  %s2345_s1 = inlined_call_operand.vmem [shape: f32[2,128,3], index: 1, kind: input, shape index: {}]   ;;  %s2346_s2 = inlined_call_operand.vmem [shape: f32[2,1,1], index: 2, kind: output, shape index: {}]  }
   0x1 LB: > { %s1215_s10 = sadd.s32 4294967295, %s1582_s9   ;;  %p1219_p0 = scmp.ge.s32.totalorder %s1582_s9, 1  ;;  %s1582_s9 = sphi %s1600_s9, %s12_s9  }
   0x2   : > { %p122_p1 = scmp.lt.s32.totalorder %s1582_s9, 3 }
   0x4   : > { %p123_p2 = pnand %p1219_p0, %p122_p1 }
   0x5   : > { %p147_p3 = scmp.lt.s32.totalorder (!%p123_p2), %s1215_s10, 1  ;;  %vm2347_vm0 = vcmask (!%p123_p2), 23552   ;;  %v160_v57 = vlaneseq (!%p123_p2) }
   0x6   : > { %126 = sbr.rel (%p123_p2) target bundleno = 943 (0x3af), region = 28  ;;  %vm1620_vm1 = vmpackc.low (!%p123_p2), %vm2347_vm0, %vm2347_vm0 }
   0x7   : > { %v1804_v60 = vshrl.u32 (!%p123_p2), %v160_v57, 7  ;;  %v1809_v63 = vand.u32 (!%p123_p2), 127, %v160_v57 }
   0x9   : > { %v162_v62 = vadd.s32 (!%p123_p2), 8, %v1804_v60  ;;  %vm179_vm3 = vcmp.eq.s32.totalorder (!%p123_p2), %v1804_v60, %v1809_v63 }
   0xb   : > { %vm180_vm2 = vcmp.eq.s32.totalorder (!%p123_p2), %v162_v62, %v1809_v63 }
   0xd   : > { %s2362_s10 = smov (!%p147_p3, %s1215_s10), 1 }
   0xe   : > { %s1291_s11 = sshll.u32 %s2362_s10, 7  ;;  %s159_s20 = scalar_lea.vmem %s2346_s2, %s2362_s10 }
   0xf   : > { %s1616_s14 = scalar_lea.vmem %s2344_s0, %s1291_s11  ;;  %s2017_s17 = scalar_lea.vmem %s2345_s1, %s1291_s11 }
  0x10   : > { %v195_v1 = vld [vmem:[%s1616_s14] sm:$0xff]  ;;  %v1626_v2 = vld [vmem:[%s1616_s14 + $0x8] sm:$0xff]  ;;  %v1629_v3 = vld [vmem:[%s1616_s14 + $0x10] sm:$0xff] }
  0x11   : > { %v1469_v4 = vpack.c.bf16 %v1626_v2, %v195_v1  ;;  %v1633_v5 = vld [vmem:[%s1616_s14 + $0x18] sm:$0xff]  ;;  %1389 = vmatprep.mubr.msk.f32.mxu0 %vm2347_vm0, %v195_v1  ;;  %v227_v6 = vmul.f32 %v195_v1, %v195_v1  ;;  %v229_v7 = vmul.f32 %v1629_v3, %v1629_v3  ;;  %v228_v8 = vmul.f32 %v1626_v2, %v1626_v2  ;;  %v1653_v13 = vld [vmem:[%s1616_s14 + $0x20] sm:$0xff]  ;;  %v1658_v14 = vld [vmem:[%s1616_s14 + $0x28] sm:$0xff] }
  0x12   : > { %v1475_v9 = vpack.c.bf16 %v1633_v5, %v1629_v3  ;;  %v230_v10 = vmul.f32 %v1633_v5, %v1633_v5  ;;  %v231_v16 = vmul.f32 %v1653_v13, %v1653_v13  ;;  %v232_v18 = vmul.f32 %v1658_v14, %v1658_v14  ;;  %v1671_v19 = vld [vmem:[%s1616_s14 + $0x30] sm:$0xff]  ;;  %v1676_v21 = vld [vmem:[%s1616_s14 + $0x38] sm:$0xff]  ;;  %v1687_v26 = vld [vmem:[%s1616_s14 + $0x40] sm:$0xff] }
  0x13   : > { %1471 = vmatprep.subr.msk.bf16.mxu0 %vm1620_vm1, %v1469_v4  ;;  %v244_v11 = vsel %vm2347_vm0, %v227_v6, 0.0  ;;  %v250_v12 = vsel %vm2347_vm0, %v229_v7, 0.0  ;;  %1519 = vmatprep.subr.msk.bf16.mxu1 %vm1620_vm1, %v1469_v4  ;;  %v247_v15 = vsel %vm2347_vm0, %v228_v8, 0.0  ;;  %v1481_v20 = vpack.c.bf16 %v1658_v14, %v1653_v13  ;;  %v1692_v27 = vld [vmem:[%s1616_s14 + $0x48] sm:$0xff]  ;;  %v1705_v32 = vld [vmem:[%s1616_s14 + $0x50] sm:$0xff]  ;;  %v1710_v34 = vld [vmem:[%s1616_s14 + $0x58] sm:$0xff] }
  0x14   : > { %1474 = vmatpush3.bf16.xpose.msk.msra.mxu0 %vm1620_vm1, %v1469_v4  ;;  %245 = vadd.xlane.f32.xlu0 %v244_v11  ;;  %v253_v17 = vsel %vm2347_vm0, %v230_v10, 0.0  ;;  %v256_v22 = vsel %vm2347_vm0, %v231_v16, 0.0  ;;  %v233_v23 = vmul.f32 %v1671_v19, %v1671_v19  ;;  %v259_v24 = vsel %vm2347_vm0, %v232_v18, 0.0  ;;  %v207_v39 = vld [vmem:[%s1616_s14 + $0x60] sm:$0xff]  ;;  %v208_v40 = vld [vmem:[%s1616_s14 + $0x68] sm:$0xff]  ;;  %v209_v45 = vld [vmem:[%s1616_s14 + $0x70] sm:$0xff] }
  0x15   : > { %1477 = vmatprep.subr.msk.bf16.mxu0 %vm1620_vm1, %v1475_v9  ;;  %251 = vadd.xlane.f32.xlu1 %v250_v12  ;;  %v234_v25 = vmul.f32 %v1676_v21, %v1676_v21  ;;  %v235_v29 = vmul.f32 %v1687_v26, %v1687_v26  ;;  %v236_v31 = vmul.f32 %v1692_v27, %v1692_v27  ;;  %v210_v47 = vld [vmem:[%s1616_s14 + $0x78] sm:$0xff]  ;;  %v1813_v1 = vadd.s32 24, %v1804_v60 }
  0x16   : > { %1522 = vmatpush3.bf16.xpose.msk.msra.mxu1 %vm1620_vm1, %v1469_v4  ;;  %v262_v28 = vsel %vm2347_vm0, %v233_v23, 0.0  ;;  %v1487_v33 = vpack.c.bf16 %v1676_v21, %v1671_v19  ;;  %v237_v36 = vmul.f32 %v1705_v32, %v1705_v32  ;;  %v238_v38 = vmul.f32 %v1710_v34, %v1710_v34 }
  0x17   : > { %1525 = vmatprep.subr.msk.bf16.mxu1 %vm1620_vm1, %v1475_v9  ;;  %v265_v30 = vsel %vm2347_vm0, %v234_v25, 0.0  ;;  %v268_v35 = vsel %vm2347_vm0, %v235_v29, 0.0  ;;  %v271_v37 = vsel %vm2347_vm0, %v236_v31, 0.0  ;;  %v239_v42 = vmul.f32 %v207_v39, %v207_v39 }
  0x18   : > { %248 = vadd.xlane.f32.xlu0 %v247_v15  ;;  %v274_v41 = vsel %vm2347_vm0, %v237_v36, 0.0  ;;  %v277_v43 = vsel %vm2347_vm0, %v238_v38, 0.0  ;;  %v240_v44 = vmul.f32 %v208_v40, %v208_v40  ;;  %v1493_v46 = vpack.c.bf16 %v1692_v27, %v1687_v26 }
  0x19   : > { %254 = vadd.xlane.f32.xlu1 %v253_v17  ;;  %v280_v48 = vsel %vm2347_vm0, %v239_v42, 0.0  ;;  %v241_v49 = vmul.f32 %v209_v45, %v209_v45  ;;  %v242_v51 = vmul.f32 %v210_v47, %v210_v47  ;;  %v1499_v54 = vpack.c.bf16 %v1710_v34, %v1705_v32 }
  0x1a   : > { %v283_v50 = vsel %vm2347_vm0, %v240_v44, 0.0  ;;  %v1505_v55 = vpack.c.bf16 %v208_v40, %v207_v39  ;;  %v1511_v56 = vpack.c.bf16 %v210_v47, %v209_v45  ;;  %vm182_vm4 = vcmp.eq.s32.totalorder %v1813_v1, %v1809_v63 }
  0x1b   : > { %v286_v52 = vsel %vm2347_vm0, %v241_v49, 0.0  ;;  %v289_v53 = vsel %vm2347_vm0, %v242_v51, 0.0  ;;  %v165_v10 = vadd.s32 32, %v1804_v60  ;;  %v1833_v16 = vadd.s32 48, %v1804_v60 }
  0x1c   : > { %1480 = vmatpush3.bf16.xpose.msk.msra.mxu0 %vm1620_vm1, %v1475_v9  ;;  %257 = vadd.xlane.f32.xlu0 %v256_v22  ;;  %v1847_v23 = vadd.s32 64, %v1804_v60  ;;  %v1864_v38 = vadd.s32 80, %v1804_v60 }
  0x1d   : > { %1483 = vmatprep.subr.msk.bf16.mxu0 %vm1620_vm1, %v1481_v20  ;;  %260 = vadd.xlane.f32.xlu1 %v259_v24  ;;  %vm183_vm7 = vcmp.eq.s32.totalorder %v165_v10, %v1809_v63  ;;  %vm185_vm9 = vcmp.eq.s32.totalorder %v1833_v16, %v1809_v63  ;;  %v176_v16 = vadd.s32 120, %v1804_v60 }
  0x1e   : > { %1528 = vmatpush3.bf16.xpose.msk.msra.mxu1 %vm1620_vm1, %v1475_v9  ;;  %v166_v9 = vadd.s32 40, %v1804_v60  ;;  %vm187_vm11 = vcmp.eq.s32.totalorder %v1847_v23, %v1809_v63  ;;  %vm189_vm13 = vcmp.eq.s32.totalorder %v1864_v38, %v1809_v63 }
  0x1f   : > { %1531 = vmatprep.subr.msk.bf16.mxu1 %vm1620_vm1, %v1481_v20 }
  0x20   : > { %263 = vadd.xlane.f32.xlu0 %v262_v28  ;;  %vm184_vm6 = vcmp.eq.s32.totalorder %v166_v9, %v1809_v63 }
  0x21   : > { %266 = vadd.xlane.f32.xlu1 %v265_v30 }
  0x24   : > { %1486 = vmatpush3.bf16.xpose.msk.msra.mxu0 %vm1620_vm1, %v1481_v20  ;;  %269 = vadd.xlane.f32.xlu0 %v268_v35 }
  0x25   : > { %1489 = vmatprep.subr.msk.bf16.mxu0 %vm1620_vm1, %v1487_v33  ;;  %272 = vadd.xlane.f32.xlu1 %v271_v37 }
  0x26   : > { %1534 = vmatpush3.bf16.xpose.msk.msra.mxu1 %vm1620_vm1, %v1481_v20 }
  0x27   : > { %1537 = vmatprep.subr.msk.bf16.mxu1 %vm1620_vm1, %v1487_v33 }
  0x28   : > { %275 = vadd.xlane.f32.xlu0 %v274_v41 }
  0x29   : > { %278 = vadd.xlane.f32.xlu1 %v277_v43 }
  0x2c   : > { %1492 = vmatpush3.bf16.xpose.msk.msra.mxu0 %vm1620_vm1, %v1487_v33  ;;  %281 = vadd.xlane.f32.xlu0 %v280_v48 }
  0x2d   : > { %1495 = vmatprep.subr.msk.bf16.mxu0 %vm1620_vm1, %v1493_v46  ;;  %284 = vadd.xlane.f32.xlu1 %v283_v50 }
  0x2e   : > { %1540 = vmatpush3.bf16.xpose.msk.msra.mxu1 %vm1620_vm1, %v1487_v33 }
  0x2f   : > { %1543 = vmatprep.subr.msk.bf16.mxu1 %vm1620_vm1, %v1493_v46 }
  0x30   : > { %287 = vadd.xlane.f32.xlu0 %v286_v52 }
  0x31   : > { %290 = vadd.xlane.f32.xlu1 %v289_v53 }
  0x34   : > { %1498 = vmatpush3.bf16.xpose.msk.msra.mxu0 %vm1620_vm1, %v1493_v46 }
  0x35   : > { %1501 = vmatprep.subr.msk.bf16.mxu0 %vm1620_vm1, %v1499_v54 }
  0x36   : > { %1546 = vmatpush3.bf16.xpose.msk.msra.mxu1 %vm1620_vm1, %v1493_v46 }
  0x37   : > { %1549 = vmatprep.subr.msk.bf16.mxu1 %vm1620_vm1, %v1499_v54 }
  0x3c   : > { %1504 = vmatpush3.bf16.xpose.msk.msra.mxu0 %vm1620_vm1, %v1499_v54 }
  0x3d   : > { %1507 = vmatprep.subr.msk.bf16.mxu0 %vm1620_vm1, %v1505_v55 }
  0x3e   : > { %1552 = vmatpush3.bf16.xpose.msk.msra.mxu1 %vm1620_vm1, %v1499_v54 }
  0x3f   : > { %1555 = vmatprep.subr.msk.bf16.mxu1 %vm1620_vm1, %v1505_v55 }
  0x44   : > { %1510 = vmatpush3.bf16.xpose.msk.msra.mxu0 %vm1620_vm1, %v1505_v55 }
  0x45   : > { %1513 = vmatprep.subr.msk.bf16.mxu0 %vm1620_vm1, %v1511_v56 }
  0x46   : > { %1558 = vmatpush3.bf16.xpose.msk.msra.mxu1 %vm1620_vm1, %v1505_v55 }
  0x47   : > { %1561 = vmatprep.subr.msk.bf16.mxu1 %vm1620_vm1, %v1511_v56 }
  0x4c   : > { %1516 = vmatpush3.bf16.xpose.msk.msra.mxu0 %vm1620_vm1, %v1511_v56 }
  0x4e   : > { %1564 = vmatpush3.bf16.xpose.msk.msra.mxu1 %vm1620_vm1, %v1511_v56  ;;  %vm194_vm1 = vcmp.eq.s32.totalorder %v176_v16, %v1809_v63  ;;  %v211_v16 = vld [vmem:[%s2017_s17] sm:$0xff] }
  0x4f   : > { %1445 = vmatprep.mubr.msk.f32.mxu1 %vm2347_vm0, %v211_v16 }
  0x53   : > { %1390 = vmatmul.mubr.msk.f32.vlgmr.msra.gmra.mrb[0].mxu0 %vm2347_vm0, %v1626_v2 }
  0x54   : > { %1392 = vmatprep.mubr.msk.f32.mxu0 %vm2347_vm0, %v1629_v3  ;;  %v1818_v3 = vadd.s32 16, %v1804_v60 }
  0x56   : > { %vm181_vm5 = vcmp.eq.s32.totalorder %v1818_v3, %v1809_v63 }
  0x57   : > { %1393 = vmatmul.mubr.msk.f32.gmra.mrb[2].mxu0 %vm2347_vm0, %v1633_v5 }
  0x58   : > { %1395 = vmatprep.mubr.msk.f32.mxu0 %vm2347_vm0, %v1653_v13  ;;  %v168_v13 = vadd.s32 56, %v1804_v60 }
  0x5a   : > { %vm186_vm8 = vcmp.eq.s32.totalorder %v168_v13, %v1809_v63 }
  0x5b   : > { %1396 = vmatmul.mubr.msk.f32.gmra.mrb[4].mxu0 %vm2347_vm0, %v1658_v14 }
  0x5c   : > { %1398 = vmatprep.mubr.msk.f32.mxu0 %vm2347_vm0, %v1671_v19 }
  0x5f   : > { %1399 = vmatmul.mubr.msk.f32.gmra.mrb[6].mxu0 %vm2347_vm0, %v1676_v21  ;;  %v1839_v21 = vadd.s32 72, %v1804_v60 }
  0x60   : > { %1401 = vmatprep.mubr.msk.f32.mxu0 %vm2347_vm0, %v1687_v26  ;;  %v1851_v26 = vadd.s32 88, %v1804_v60 }
  0x61   : > { %vm188_vm10 = vcmp.eq.s32.totalorder %v1839_v21, %v1809_v63 }
  0x62   : > { %vm190_vm12 = vcmp.eq.s32.totalorder %v1851_v26, %v1809_v63 }
  0x63   : > { %1402 = vmatmul.mubr.msk.f32.gmra.mrb[8].mxu0 %vm2347_vm0, %v1692_v27 }
  0x64   : > { %1404 = vmatprep.mubr.msk.f32.mxu0 %vm2347_vm0, %v1705_v32 }
  0x67   : > { %1405 = vmatmul.mubr.msk.f32.gmra.mrb[10].mxu0 %vm2347_vm0, %v1710_v34 }
  0x68   : > { %1407 = vmatprep.mubr.msk.f32.mxu0 %vm2347_vm0, %v207_v39 }
  0x6b   : > { %1408 = vmatmul.mubr.msk.f32.gmra.mrb[12].mxu0 %vm2347_vm0, %v208_v40 }
  0x6c   : > { %1410 = vmatprep.mubr.msk.f32.mxu0 %vm2347_vm0, %v209_v45 }
  0x6f   : > { %1411 = vmatmul.mubr.msk.f32.gmra.mrb[14].mxu0 %vm2347_vm0, %v210_v47 }
  0xa1   : > { %v246_v59 = vpop.xlane.xlu0 %245 }
  0xa2   : > { %v1802_v58 = vpop.xlane.xlu1 %251 }
  0xa5   : > { %v249_v0 = vpop.xlane.xlu0 %248 }
  0xa6   : > { %v1806_v61 = vpop.xlane.xlu1 %254 }
  0xa9   : > { %v258_v4 = vpop.xlane.xlu0 %257 }
  0xaa   : > { %v261_v2 = vpop.xlane.xlu1 %260 }
  0xad   : > { %v264_v20 = vpop.xlane.xlu0 %263 }
  0xae   : > { %v267_v17 = vpop.xlane.xlu1 %266 }
  0xb1   : > { %v270_v42 = vpop.xlane.xlu0 %269 }
  0xb2   : > { %v273_v37 = vpop.xlane.xlu1 %272 }
 0x126   : > { %v1391_v5 = vpop.f32.mrb[0].mxu0 }
 0x127   : > { %v743_v6 = vsel %vm180_vm2, %v1391_v5, 0.0  ;;  %v470_v7 = vpop.f32.mrb[1].mxu0  ;;  %v838_v11 = vmul.f32 2.0, %v1391_v5  ;;  %v279_v5 = vpop.xlane.xlu1 %278 }
 0x128   : > { %v742_v8 = vsel %vm179_vm3, %v470_v7, 0.0  ;;  %v837_v14 = vmul.f32 2.0, %v470_v7 }
 0x129   : > { %v758_v12 = vadd.f32 %v743_v6, %v742_v8  ;;  %v854_v24 = vsub.f32 %v249_v0, %v838_v11  ;;  %v173_v6 = vadd.s32 96, %v1804_v60  ;;  %v276_v11 = vpop.xlane.xlu0 %275 }
 0x12a   : > { %v1394_v15 = vpop.f32.mrb[2].mxu0  ;;  %v853_v27 = vsub.f32 %v246_v59, %v837_v14 }
 0x12b   : > { %v745_v18 = vsel %vm182_vm4, %v1394_v15, 0.0  ;;  %v480_v19 = vpop.f32.mrb[3].mxu0  ;;  %v840_v28 = vmul.f32 2.0, %v1394_v15  ;;  %v1868_v39 = vsel %vm180_vm2, 1e+30, %v854_v24  ;;  %vm191_vm15 = vcmp.eq.s32.totalorder %v173_v6, %v1809_v63 }
 0x12c   : > { %v744_v22 = vsel %vm181_vm5, %v480_v19, 0.0  ;;  %v839_v29 = vmul.f32 2.0, %v480_v19  ;;  %v1875_v43 = vsel %vm179_vm3, 1e+30, %v853_v27 }
 0x12d   : > { %v759_v25 = vadd.f32 %v758_v12, %v744_v22  ;;  %v856_v45 = vsub.f32 %v1806_v61, %v840_v28  ;;  %v174_v61 = vadd.s32 104, %v1804_v60 }
 0x12e   : > { %v1397_v30 = vpop.f32.mrb[4].mxu0  ;;  %v855_v44 = vsub.f32 %v1802_v58, %v839_v29 }
 0x12f   : > { %v747_v31 = vsel %vm184_vm6, %v1397_v30, 0.0  ;;  %v842_v32 = vmul.f32 2.0, %v1397_v30  ;;  %v490_v33 = vpop.f32.mrb[5].mxu0  ;;  %v760_v34 = vadd.f32 %v759_v25, %v745_v18  ;;  %v1905_v0 = vsel %vm182_vm4, 1e+30, %v856_v45 }
 0x130   : > { %v746_v35 = vsel %vm183_vm7, %v490_v33, 0.0  ;;  %v841_v36 = vmul.f32 2.0, %v490_v33  ;;  %v1900_v62 = vsel %vm181_vm5, 1e+30, %v855_v44  ;;  %vm192_vm14 = vcmp.eq.s32.totalorder %v174_v61, %v1809_v63 }
 0x131   : > { %v761_v40 = vadd.f32 %v760_v34, %v746_v35  ;;  %v858_v41 = vsub.f32 %v261_v2, %v842_v32  ;;  %v285_v32 = vpop.xlane.xlu1 %284 }
 0x132   : > { %v857_v46 = vsub.f32 %v258_v4, %v841_v36  ;;  %v1400_v47 = vpop.f32.mrb[6].mxu0  ;;  %v282_v36 = vpop.xlane.xlu0 %281 }
 0x133   : > { %v1881_v48 = vsel %vm184_vm6, 1e+30, %v858_v41  ;;  %v749_v49 = vsel %vm186_vm8, %v1400_v47, 0.0  ;;  %v844_v50 = vmul.f32 2.0, %v1400_v47  ;;  %v500_v51 = vpop.f32.mrb[7].mxu0  ;;  %v762_v52 = vadd.f32 %v761_v40, %v747_v31 }
 0x134   : > { %v886_v53 = vmin.f32 %v1868_v39, %v1881_v48  ;;  %v1889_v54 = vsel %vm183_vm7, 1e+30, %v857_v46  ;;  %v748_v55 = vsel %vm185_vm9, %v500_v51, 0.0  ;;  %v843_v56 = vmul.f32 2.0, %v500_v51 }
 0x135   : > { %v885_v57 = vmin.f32 %v1875_v43, %v1889_v54  ;;  %v763_v58 = vadd.f32 %v762_v52, %v748_v55  ;;  %v860_v59 = vsub.f32 %v267_v17, %v844_v50 }
 0x136   : > { %v859_v2 = vsub.f32 %v264_v20, %v843_v56  ;;  %v1403_v4 = vpop.f32.mrb[8].mxu0  ;;  %v291_v56 = vpop.xlane.xlu1 %290 }
 0x137   : > { %v1910_v7 = vsel %vm186_vm8, 1e+30, %v860_v59  ;;  %v751_v3 = vsel %vm188_vm10, %v1403_v4, 0.0  ;;  %v846_v8 = vmul.f32 2.0, %v1403_v4  ;;  %v510_v9 = vpop.f32.mrb[9].mxu0  ;;  %v764_v10 = vadd.f32 %v763_v58, %v749_v49  ;;  %v288_v4 = vpop.xlane.xlu0 %287 }
 0x138   : > { %v888_v1 = vmin.f32 %v1905_v0, %v1910_v7  ;;  %v1920_v12 = vsel %vm185_vm9, 1e+30, %v859_v2  ;;  %v750_v13 = vsel %vm187_vm11, %v510_v9, 0.0  ;;  %v845_v14 = vmul.f32 2.0, %v510_v9 }
 0x139   : > { %v887_v15 = vmin.f32 %v1900_v62, %v1920_v12  ;;  %v765_v17 = vadd.f32 %v764_v10, %v750_v13  ;;  %v862_v18 = vsub.f32 %v273_v37, %v846_v8  ;;  %v175_v37 = vadd.s32 112, %v1804_v60 }
 0x13a   : > { %v861_v19 = vsub.f32 %v270_v42, %v845_v14  ;;  %v1406_v20 = vpop.f32.mrb[10].mxu0 }
 0x13b   : > { %v1935_v22 = vsel %vm188_vm10, 1e+30, %v862_v18  ;;  %v753_v24 = vsel %vm190_vm12, %v1406_v20, 0.0  ;;  %v848_v25 = vmul.f32 2.0, %v1406_v20  ;;  %v520_v27 = vpop.f32.mrb[11].mxu0  ;;  %v766_v28 = vadd.f32 %v765_v17, %v751_v3 }
 0x13c   : > { %v890_v29 = vmin.f32 %v886_v53, %v1935_v22  ;;  %v1944_v30 = vsel %vm187_vm11, 1e+30, %v861_v19  ;;  %v752_v21 = vsel %vm189_vm13, %v520_v27, 0.0  ;;  %v847_v31 = vmul.f32 2.0, %v520_v27 }
 0x13d   : > { %v889_v33 = vmin.f32 %v885_v57, %v1944_v30  ;;  %v767_v34 = vadd.f32 %v766_v28, %v752_v21  ;;  %v864_v35 = vsub.f32 %v279_v5, %v848_v25  ;;  %vm193_vm2 = vcmp.eq.s32.totalorder %v175_v37, %v1809_v63 }
 0x13e   : > { %v863_v40 = vsub.f32 %v276_v11, %v847_v31  ;;  %v1409_v41 = vpop.f32.mrb[12].mxu0  ;;  %v2026_v31 = vld [vmem:[%s2017_s17 + $0x8] sm:$0xff] }
 0x13f   : > { %v1955_v23 = vsel %vm190_vm12, 1e+30, %v864_v35  ;;  %v755_v42 = vsel %vm192_vm14, %v1409_v41, 0.0  ;;  %v850_v44 = vmul.f32 2.0, %v1409_v41  ;;  %v530_v45 = vpop.f32.mrb[13].mxu0  ;;  %v768_v46 = vadd.f32 %v767_v34, %v753_v24  ;;  %1446 = vmatmul.mubr.msk.f32.vlgmr.msra.gmra.mrb[0].mxu1 %vm2347_vm0, %v2026_v31 }
 0x140   : > { %v892_v47 = vmin.f32 %v888_v1, %v1955_v23  ;;  %v1963_v60 = vsel %vm189_vm13, 1e+30, %v863_v40  ;;  %v754_v49 = vsel %vm191_vm15, %v530_v45, 0.0  ;;  %v849_v50 = vmul.f32 2.0, %v530_v45 }
 0x141   : > { %v891_v26 = vmin.f32 %v887_v15, %v1963_v60  ;;  %v769_v51 = vadd.f32 %v768_v46, %v754_v49  ;;  %v866_v52 = vsub.f32 %v285_v32, %v850_v44  ;;  %v213_v32 = vld [vmem:[%s2017_s17 + $0x10] sm:$0xff]  ;;  %v215_v49 = vld [vmem:[%s2017_s17 + $0x20] sm:$0xff] }
 0x142   : > { %v865_v53 = vsub.f32 %v282_v36, %v849_v50  ;;  %v1412_v55 = vpop.f32.mrb[14].mxu0  ;;  %v292_v36 = vmul.f32 %v211_v16, %v211_v16  ;;  %1448 = vmatprep.mubr.msk.f32.mxu1 %vm2347_vm0, %v213_v32 }
 0x143   : > { %v1971_v57 = vsel %vm192_vm14, 1e+30, %v866_v52  ;;  %v757_v38 = vsel %vm194_vm1, %v1412_v55, 0.0  ;;  %v852_v58 = vmul.f32 2.0, %v1412_v55  ;;  %v540_v59 = vpop.f32.mrb[15].mxu0  ;;  %v770_v2 = vadd.f32 %v769_v51, %v755_v42 }
 0x144   : > { %v894_v5 = vmin.f32 %v890_v29, %v1971_v57  ;;  %v881_v3 = vsel %vm191_vm15, 1e+30, %v865_v53  ;;  %v756_v8 = vsel %vm193_vm2, %v540_v59, 0.0  ;;  %v851_v9 = vmul.f32 2.0, %v540_v59 }
 0x145   : > { %v893_v10 = vmin.f32 %v889_v33, %v881_v3  ;;  %v771_v61 = vadd.f32 %v770_v2, %v756_v8  ;;  %v868_v11 = vsub.f32 %v291_v56, %v852_v58  ;;  %v294_v51 = vmul.f32 %v213_v32, %v213_v32  ;;  %v2146_v56 = vld [vmem:[%s2017_s17 + $0x28] sm:$0xff]  ;;  %v2159_v8 = vld [vmem:[%s2017_s17 + $0x40] sm:$0xff]  ;;  %v2184_v32 = vld [vmem:[%s2017_s17 + $0x70] sm:$0xff] }
 0x146   : > { %v867_v1 = vsub.f32 %v288_v4, %v851_v9  ;;  %v296_v59 = vmul.f32 %v215_v49, %v215_v49 }
 0x147   : > { %v897_v13 = vmin.f32 %v893_v10, %v894_v5  ;;  %v1980_v14 = vadd.f32 %v771_v61, %v757_v38  ;;  %v884_v15 = vsel %vm194_vm1, 1e+30, %v868_v11  ;;  %v217_v38 = vld [vmem:[%s2017_s17 + $0x30] sm:$0xff]  ;;  %v314_v58 = vsel %vm2347_vm0, %v294_v51, 0.0 }
 0x148   : > { %v896_v17 = vmin.f32 %v892_v47, %v884_v15  ;;  %v883_v18 = vsel %vm193_vm2, 1e+30, %v867_v1  ;;  %v320_v9 = vsel %vm2347_vm0, %v296_v59, 0.0  ;;  %v298_v10 = vmul.f32 %v217_v38, %v217_v38  ;;  %v220_v1 = vld [vmem:[%s2017_s17 + $0x48] sm:$0xff] }
 0x149   : > { %v895_v6 = vmin.f32 %v891_v26, %v883_v18  ;;  %v308_v26 = vsel %vm2347_vm0, %v292_v36, 0.0 }
 0x14a   : > { %309 = vadd.xlane.f32.xlu1 %v308_v26 }
 0x14b   : > { %v898_v19 = vmin.f32 %v895_v6, %v896_v17  ;;  %v301_v17 = vmul.f32 %v220_v1, %v220_v1 }
 0x14d   : > { %v899_v20 = vmin.f32 %v897_v13, %v898_v19  ;;  %v2168_v13 = vld [vmem:[%s2017_s17 + $0x50] sm:$0xff]  ;;  %v222_v19 = vld [vmem:[%s2017_s17 + $0x58] sm:$0xff] }
 0x14e   : > { %315 = vadd.xlane.f32.xlu1 %v314_v58 }
 0x14f   : > { %v900_v24 = vrot.slane %v899_v20, 4 }
 0x151   : > { %v901_v25 = vmin.f32 %v899_v20, %v900_v24  ;;  %v2176_v20 = vld [vmem:[%s2017_s17 + $0x60] sm:$0xff]  ;;  %v335_v24 = vsel %vm2347_vm0, %v301_v17, 0.0 }
 0x152   : > { %321 = vadd.xlane.f32.xlu1 %v320_v9 }
 0x153   : > { %v902_v27 = vrot.slane %v901_v25, 2 }
 0x155   : > { %v903_v28 = vmin.f32 %v901_v25, %v902_v27  ;;  %v224_v27 = vld [vmem:[%s2017_s17 + $0x68] sm:$0xff] }
 0x157   : > { %v904_v29 = vrot.slane %v903_v28, 1 }
 0x159   : > { %v1986_v21 = vmin.f32 %v903_v28, %v904_v29  ;;  %v303_v28 = vmul.f32 %v222_v19, %v222_v19  ;;  %v305_v29 = vmul.f32 %v224_v27, %v224_v27 }
 0x15b   : > { %vm907_vm3 = vcmp.eq.f32.partialorder %v1875_v43, %v1986_v21  ;;  %vm908_vm4 = vcmp.eq.f32.partialorder %v1868_v39, %v1986_v21  ;;  %vm909_vm5 = vcmp.eq.f32.partialorder %v1900_v62, %v1986_v21  ;;  %vm910_vm6 = vcmp.eq.f32.partialorder %v1905_v0, %v1986_v21 }
 0x15c   : > { %vm911_vm7 = vcmp.eq.f32.partialorder %v1889_v54, %v1986_v21  ;;  %vm912_vm8 = vcmp.eq.f32.partialorder %v1881_v48, %v1986_v21  ;;  %vm913_vm9 = vcmp.eq.f32.partialorder %v1920_v12, %v1986_v21  ;;  %vm914_vm10 = vcmp.eq.f32.partialorder %v1910_v7, %v1986_v21 }
 0x15d   : > { %vm915_vm11 = vcmp.eq.f32.partialorder %v1944_v30, %v1986_v21  ;;  %vm916_vm12 = vcmp.eq.f32.partialorder %v1935_v22, %v1986_v21  ;;  %vm918_vm14 = vcmp.eq.f32.partialorder %v1955_v23, %v1986_v21  ;;  %vm919_vm15 = vcmp.eq.f32.partialorder %v881_v3, %v1986_v21 }
 0x15e   : > { %vm920_vm1 = vcmp.eq.f32.partialorder %v1971_v57, %v1986_v21  ;;  %vm921_vm2 = vcmp.eq.f32.partialorder %v883_v18, %v1986_v21  ;;  %vm922_vm13 = vcmp.eq.f32.partialorder %v884_v15, %v1986_v21  ;;  %v2033_v33 = vsel %vm907_vm3, 1e+30, %v1875_v43 }
 0x15f   : > { %v2039_v34 = vsel %vm908_vm4, 1e+30, %v1868_v39  ;;  %v2045_v35 = vsel %vm909_vm5, 1e+30, %v1900_v62  ;;  %v2052_v43 = vsel %vm910_vm6, 1e+30, %v1905_v0  ;;  %vm2350_vm3 = vcmp.eq.f32.partialorder %v1963_v60, %v1986_v21 }
 0x160   : > { %v2058_v39 = vsel %vm911_vm7, 1e+30, %v1889_v54  ;;  %v2064_v62 = vsel %vm912_vm8, 1e+30, %v1881_v48  ;;  %v2072_v0 = vsel %vm913_vm9, 1e+30, %v1920_v12 }
 0x161   : > { %v2078_v54 = vsel %vm914_vm10, 1e+30, %v1910_v7  ;;  %v2084_v48 = vsel %vm915_vm11, 1e+30, %v1944_v30  ;;  %v939_v37 = vmin.f32 %v2033_v33, %v2058_v39  ;;  %v2093_v12 = vsel %vm916_vm12, 1e+30, %v1935_v22 }
 0x162   : > { %v2099_v7 = vsel %vm2350_vm3, 1e+30, %v1963_v60  ;;  %v2105_v30 = vsel %vm918_vm14, 1e+30, %v1955_v23  ;;  %v940_v40 = vmin.f32 %v2039_v34, %v2064_v62  ;;  %v2111_v41 = vsel %vm919_vm15, 1e+30, %v881_v3 }
 0x163   : > { %v2117_v22 = vsel %vm920_vm1, 1e+30, %v1971_v57  ;;  %v2121_v42 = vsel %vm921_vm2, 1e+30, %v883_v18  ;;  %v941_v23 = vmin.f32 %v2045_v35, %v2072_v0  ;;  %v2127_v44 = vsel %vm922_vm13, 1e+30, %v884_v15 }
 0x164   : > { %v942_v45 = vmin.f32 %v2052_v43, %v2078_v54  ;;  %v943_v46 = vmin.f32 %v939_v37, %v2084_v48  ;;  %v944_v47 = vmin.f32 %v940_v40, %v2093_v12  ;;  %v2134_v60 = vld [vmem:[%s2017_s17 + $0x18] sm:$0xff]  ;;  %v326_v15 = vsel %vm2347_vm0, %v298_v10, 0.0 }
 0x165   : > { %v945_v50 = vmin.f32 %v941_v23, %v2099_v7  ;;  %1449 = vmatmul.mubr.msk.f32.gmra.mrb[2].mxu1 %vm2347_vm0, %v2134_v60  ;;  %v2156_v3 = vld [vmem:[%s2017_s17 + $0x38] sm:$0xff]  ;;  %327 = vadd.xlane.f32.xlu1 %v326_v15  ;;  %v341_v37 = vsel %vm2347_vm0, %v303_v28, 0.0  ;;  %v347_v40 = vsel %vm2347_vm0, %v305_v29, 0.0 }
 0x166   : > { %v946_v52 = vmin.f32 %v942_v45, %v2105_v30  ;;  %v947_v53 = vmin.f32 %v943_v46, %v2111_v41  ;;  %v948_v55 = vmin.f32 %v944_v47, %v2117_v22  ;;  %1451 = vmatprep.mubr.msk.f32.mxu1 %vm2347_vm0, %v215_v49  ;;  %v2196_v23 = vld [vmem:[%s2017_s17 + $0x78] sm:$0xff] }
 0x167   : > { %v949_v57 = vmin.f32 %v945_v50, %v2121_v42 }
 0x168   : > { %v950_v2 = vmin.f32 %v946_v52, %v2127_v44  ;;  %v951_v4 = vmin.f32 %v947_v53, %v948_v55 }
 0x169   : > { %1452 = vmatmul.mubr.msk.f32.gmra.mrb[4].mxu1 %vm2347_vm0, %v2146_v56  ;;  %336 = vadd.xlane.f32.xlu1 %v335_v24 }
 0x16a   : > { %v952_v5 = vmin.f32 %v949_v57, %v950_v2  ;;  %1454 = vmatprep.mubr.msk.f32.mxu1 %vm2347_vm0, %v217_v38 }
 0x16c   : > { %v953_v61 = vmin.f32 %v951_v4, %v952_v5 }
 0x16d   : > { %1455 = vmatmul.mubr.msk.f32.gmra.mrb[6].mxu1 %vm2347_vm0, %v2156_v3  ;;  %342 = vadd.xlane.f32.xlu1 %v341_v37 }
 0x16e   : > { %v954_v11 = vrot.slane %v953_v61, 4  ;;  %1457 = vmatprep.mubr.msk.f32.mxu1 %vm2347_vm0, %v2159_v8 }
 0x170   : > { %v955_v18 = vmin.f32 %v953_v61, %v954_v11 }
 0x171   : > { %1458 = vmatmul.mubr.msk.f32.gmra.mrb[8].mxu1 %vm2347_vm0, %v220_v1  ;;  %348 = vadd.xlane.f32.xlu1 %v347_v40 }
 0x172   : > { %v956_v6 = vrot.slane %v955_v18, 2  ;;  %1460 = vmatprep.mubr.msk.f32.mxu1 %vm2347_vm0, %v2168_v13 }
 0x174   : > { %v957_v25 = vmin.f32 %v955_v18, %v956_v6 }
 0x175   : > { %1461 = vmatmul.mubr.msk.f32.gmra.mrb[10].mxu1 %vm2347_vm0, %v222_v19 }
 0x176   : > { %v958_v16 = vrot.slane %v957_v25, 1  ;;  %1463 = vmatprep.mubr.msk.f32.mxu1 %vm2347_vm0, %v2176_v20 }
 0x178   : > { %v959_v36 = vmin.f32 %v957_v25, %v958_v16 }
 0x179   : > { %1464 = vmatmul.mubr.msk.f32.gmra.mrb[12].mxu1 %vm2347_vm0, %v224_v27 }
 0x17a   : > { %vm961_vm4 = vcmp.eq.f32.partialorder %v2033_v33, %v959_v36  ;;  %vm962_vm5 = vcmp.eq.f32.partialorder %v2039_v34, %v959_v36  ;;  %vm963_vm6 = vcmp.eq.f32.partialorder %v2045_v35, %v959_v36  ;;  %vm964_vm7 = vcmp.eq.f32.partialorder %v2052_v43, %v959_v36  ;;  %1466 = vmatprep.mubr.msk.f32.mxu1 %vm2347_vm0, %v2184_v32 }
 0x17b   : > { %vm965_vm8 = vcmp.eq.f32.partialorder %v2058_v39, %v959_v36  ;;  %vm967_vm10 = vcmp.eq.f32.partialorder %v2072_v0, %v959_v36  ;;  %vm968_vm11 = vcmp.eq.f32.partialorder %v2078_v54, %v959_v36  ;;  %vm969_vm12 = vcmp.eq.f32.partialorder %v2084_v48, %v959_v36 }
 0x17c   : > { %vm970_vm13 = vcmp.eq.f32.partialorder %v2093_v12, %v959_v36  ;;  %vm971_vm14 = vcmp.eq.f32.partialorder %v2099_v7, %v959_v36  ;;  %vm972_vm15 = vcmp.eq.f32.partialorder %v2105_v30, %v959_v36  ;;  %vm973_vm1 = vcmp.eq.f32.partialorder %v2111_v41, %v959_v36 }
 0x17d   : > { %vm974_vm2 = vcmp.eq.f32.partialorder %v2117_v22, %v959_v36  ;;  %vm975_vm3 = vcmp.eq.f32.partialorder %v2121_v42, %v959_v36  ;;  %vm976_vm9 = vcmp.eq.f32.partialorder %v2127_v44, %v959_v36  ;;  %1467 = vmatmul.mubr.msk.f32.gmra.mrb[14].mxu1 %vm2347_vm0, %v2196_v23  ;;  %v977_v45 = vsel %vm961_vm4, 1e+30, %v2033_v33 }
 0x17e   : > { %v978_v46 = vsel %vm962_vm5, 1e+30, %v2039_v34  ;;  %v979_v47 = vsel %vm963_vm6, 1e+30, %v2045_v35  ;;  %v960_v49 = vadd.f32 %v959_v36, %v1986_v21  ;;  %v980_v50 = vsel %vm964_vm7, 1e+30, %v2052_v43 }
 0x17f   : > { %v981_v26 = vsel %vm965_vm8, 1e+30, %v2058_v39  ;;  %vm2351_vm4 = vcmp.eq.f32.partialorder %v2064_v62, %v959_v36  ;;  %v983_v34 = vsel %vm967_vm10, 1e+30, %v2072_v0  ;;  %v984_v21 = vsel %vm968_vm11, 1e+30, %v2078_v54 }
 0x180   : > { %v982_v33 = vsel %vm2351_vm4, 1e+30, %v2064_v62  ;;  %v985_v35 = vsel %vm969_vm12, 1e+30, %v2084_v48  ;;  %v993_v43 = vmin.f32 %v977_v45, %v981_v26  ;;  %v986_v39 = vsel %vm970_vm13, 1e+30, %v2093_v12 }
 0x181   : > { %v987_v62 = vsel %vm971_vm14, 1e+30, %v2099_v7  ;;  %v988_v0 = vsel %vm972_vm15, 1e+30, %v2105_v30  ;;  %v994_v51 = vmin.f32 %v978_v46, %v982_v33  ;;  %v989_v54 = vsel %vm973_vm1, 1e+30, %v2111_v41 }
 0x182   : > { %v990_v48 = vsel %vm974_vm2, 1e+30, %v2117_v22  ;;  %v991_v12 = vsel %vm975_vm3, 1e+30, %v2121_v42  ;;  %v995_v52 = vmin.f32 %v979_v47, %v983_v34  ;;  %v992_v7 = vsel %vm976_vm9, 1e+30, %v2127_v44 }
 0x183   : > { %v996_v53 = vmin.f32 %v980_v50, %v984_v21  ;;  %v997_v30 = vmin.f32 %v993_v43, %v985_v35  ;;  %v998_v55 = vmin.f32 %v994_v51, %v986_v39 }
 0x184   : > { %v999_v57 = vmin.f32 %v995_v52, %v987_v62 }
 0x185   : > { %v1000_v38 = vmin.f32 %v996_v53, %v988_v0  ;;  %v1001_v58 = vmin.f32 %v997_v30, %v989_v54  ;;  %v1002_v41 = vmin.f32 %v998_v55, %v990_v48 }
 0x186   : > { %v1003_v59 = vmin.f32 %v999_v57, %v991_v12 }
 0x187   : > { %v1004_v2 = vmin.f32 %v1000_v38, %v992_v7  ;;  %v1005_v4 = vmin.f32 %v1001_v58, %v1002_v41 }
 0x189   : > { %v1006_v22 = vmin.f32 %v1003_v59, %v1004_v2 }
 0x18b   : > { %v1007_v5 = vmin.f32 %v1005_v4, %v1006_v22 }
 0x18d   : > { %v1008_v9 = vrot.slane %v1007_v5, 4 }
 0x18f   : > { %v1009_v10 = vmin.f32 %v1007_v5, %v1008_v9 }
 0x191   : > { %v1010_v42 = vrot.slane %v1009_v10, 2 }
 0x193   : > { %v1011_v61 = vmin.f32 %v1009_v10, %v1010_v42 }
 0x195   : > { %v1012_v11 = vrot.slane %v1011_v61, 1 }
 0x197   : > { %v1013_v1 = vmin.f32 %v1011_v61, %v1012_v11 }
 0x199   : > { %vm1015_vm5 = vcmp.eq.f32.partialorder %v977_v45, %v1013_v1  ;;  %vm1016_vm6 = vcmp.eq.f32.partialorder %v978_v46, %v1013_v1  ;;  %vm1017_vm7 = vcmp.eq.f32.partialorder %v979_v47, %v1013_v1  ;;  %vm1018_vm8 = vcmp.eq.f32.partialorder %v980_v50, %v1013_v1 }
 0x19a   : > { %vm1019_vm9 = vcmp.eq.f32.partialorder %v981_v26, %v1013_v1  ;;  %vm1020_vm10 = vcmp.eq.f32.partialorder %v982_v33, %v1013_v1  ;;  %vm1021_vm11 = vcmp.eq.f32.partialorder %v983_v34, %v1013_v1  ;;  %vm1022_vm12 = vcmp.eq.f32.partialorder %v984_v21, %v1013_v1 }
 0x19b   : > { %vm1023_vm13 = vcmp.eq.f32.partialorder %v985_v35, %v1013_v1  ;;  %vm1024_vm14 = vcmp.eq.f32.partialorder %v986_v39, %v1013_v1  ;;  %vm1025_vm15 = vcmp.eq.f32.partialorder %v987_v62, %v1013_v1  ;;  %vm1026_vm1 = vcmp.eq.f32.partialorder %v988_v0, %v1013_v1 }
 0x19c   : > { %vm1027_vm2 = vcmp.eq.f32.partialorder %v989_v54, %v1013_v1  ;;  %vm1028_vm3 = vcmp.eq.f32.partialorder %v990_v48, %v1013_v1  ;;  %vm1029_vm4 = vcmp.eq.f32.partialorder %v991_v12, %v1013_v1  ;;  %vm1030_vm0 = vcmp.eq.f32.partialorder %v992_v7, %v1013_v1 }
 0x19d   : > { %v1031_v44 = vsel %vm1015_vm5, 1e+30, %v977_v45  ;;  %v1032_v15 = vsel %vm1016_vm6, 1e+30, %v978_v46  ;;  %v1033_v17 = vsel %vm1017_vm7, 1e+30, %v979_v47  ;;  %v1014_v18 = vadd.f32 %v1013_v1, %v960_v49 }
 0x19e   : > { %v1034_v6 = vsel %vm1018_vm8, 1e+30, %v980_v50  ;;  %v1035_v19 = vsel %vm1019_vm9, 1e+30, %v981_v26  ;;  %v1036_v24 = vsel %vm1020_vm10, 1e+30, %v982_v33 }
 0x19f   : > { %v1037_v25 = vsel %vm1021_vm11, 1e+30, %v983_v34  ;;  %v1038_v27 = vsel %vm1022_vm12, 1e+30, %v984_v21  ;;  %v1039_v28 = vsel %vm1023_vm13, 1e+30, %v985_v35  ;;  %v1047_v29 = vmin.f32 %v1031_v44, %v1035_v19 }
 0x1a0   : > { %v1040_v16 = vsel %vm1024_vm14, 1e+30, %v986_v39  ;;  %v1041_v36 = vsel %vm1025_vm15, 1e+30, %v987_v62  ;;  %v1042_v37 = vsel %vm1026_vm1, 1e+30, %v988_v0  ;;  %v1048_v40 = vmin.f32 %v1032_v15, %v1036_v24 }
 0x1a1   : > { %v1043_v45 = vsel %vm1027_vm2, 1e+30, %v989_v54  ;;  %v1044_v46 = vsel %vm1028_vm3, 1e+30, %v990_v48  ;;  %v1045_v47 = vsel %vm1029_vm4, 1e+30, %v991_v12  ;;  %v1049_v49 = vmin.f32 %v1033_v17, %v1037_v25 }
 0x1a2   : > { %v1046_v50 = vsel %vm1030_vm0, 1e+30, %v992_v7  ;;  %v1050_v26 = vmin.f32 %v1034_v6, %v1038_v27  ;;  %v1051_v33 = vmin.f32 %v1047_v29, %v1039_v28  ;;  %v1052_v34 = vmin.f32 %v1048_v40, %v1040_v16 }
 0x1a3   : > { %v1053_v21 = vmin.f32 %v1049_v49, %v1041_v36 }
 0x1a4   : > { %v1054_v35 = vmin.f32 %v1050_v26, %v1042_v37  ;;  %v1055_v43 = vmin.f32 %v1051_v33, %v1043_v45  ;;  %v1056_v39 = vmin.f32 %v1052_v34, %v1044_v46 }
 0x1a5   : > { %v1057_v62 = vmin.f32 %v1053_v21, %v1045_v47 }
 0x1a6   : > { %v1058_v51 = vmin.f32 %v1054_v35, %v1046_v50  ;;  %v1059_v0 = vmin.f32 %v1055_v43, %v1056_v39 }
 0x1a8   : > { %v1060_v52 = vmin.f32 %v1057_v62, %v1058_v51 }
 0x1aa   : > { %v1061_v53 = vmin.f32 %v1059_v0, %v1060_v52 }
 0x1ac   : > { %v1062_v54 = vrot.slane %v1061_v53, 4 }
 0x1ae   : > { %v1063_v30 = vmin.f32 %v1061_v53, %v1062_v54  ;;  %v293_v53 = vmul.f32 %v2026_v31, %v2026_v31  ;;  %v299_v31 = vmul.f32 %v2156_v3, %v2156_v3 }
 0x1b0   : > { %v1064_v48 = vrot.slane %v1063_v30, 2 }
 0x1b2   : > { %v1065_v55 = vmin.f32 %v1063_v30, %v1064_v48  ;;  %v295_v30 = vmul.f32 %v2134_v60, %v2134_v60 }
 0x1b4   : > { %v1066_v12 = vrot.slane %v1065_v55, 1 }
 0x1b6   : > { %v1067_v57 = vmin.f32 %v1065_v55, %v1066_v12  ;;  %v297_v55 = vmul.f32 %v2146_v56, %v2146_v56 }
 0x1b8   : > { %vm1069_vm5 = vcmp.eq.f32.partialorder %v1031_v44, %v1067_v57  ;;  %vm1070_vm0 = vcmp.eq.f32.partialorder %v1032_v15, %v1067_v57  ;;  %vm1071_vm6 = vcmp.eq.f32.partialorder %v1033_v17, %v1067_v57  ;;  %vm1072_vm7 = vcmp.eq.f32.partialorder %v1034_v6, %v1067_v57 }
 0x1b9   : > { %vm1073_vm8 = vcmp.eq.f32.partialorder %v1035_v19, %v1067_v57  ;;  %vm1074_vm9 = vcmp.eq.f32.partialorder %v1036_v24, %v1067_v57  ;;  %vm1075_vm10 = vcmp.eq.f32.partialorder %v1037_v25, %v1067_v57  ;;  %vm1076_vm11 = vcmp.eq.f32.partialorder %v1038_v27, %v1067_v57 }
 0x1ba   : > { %vm1077_vm12 = vcmp.eq.f32.partialorder %v1039_v28, %v1067_v57  ;;  %vm1078_vm13 = vcmp.eq.f32.partialorder %v1040_v16, %v1067_v57  ;;  %vm1079_vm14 = vcmp.eq.f32.partialorder %v1041_v36, %v1067_v57  ;;  %vm1080_vm15 = vcmp.eq.f32.partialorder %v1042_v37, %v1067_v57 }
 0x1bb   : > { %vm1081_vm1 = vcmp.eq.f32.partialorder %v1043_v45, %v1067_v57  ;;  %vm1082_vm2 = vcmp.eq.f32.partialorder %v1044_v46, %v1067_v57  ;;  %vm1083_vm3 = vcmp.eq.f32.partialorder %v1045_v47, %v1067_v57  ;;  %vm1084_vm4 = vcmp.eq.f32.partialorder %v1046_v50, %v1067_v57 }
 0x1bc   : > { %v1085_v7 = vsel %vm1069_vm5, 1e+30, %v1031_v44  ;;  %v1086_v38 = vsel %vm1070_vm0, 1e+30, %v1032_v15  ;;  %v1087_v58 = vsel %vm1071_vm6, 1e+30, %v1033_v17  ;;  %v1068_v41 = vadd.f32 %v1067_v57, %v1014_v18 }
 0x1bd   : > { %v1088_v59 = vsel %vm1072_vm7, 1e+30, %v1034_v6  ;;  %v1089_v2 = vsel %vm1073_vm8, 1e+30, %v1035_v19  ;;  %v1090_v4 = vsel %vm1074_vm9, 1e+30, %v1036_v24 }
 0x1be   : > { %v1091_v22 = vsel %vm1075_vm10, 1e+30, %v1037_v25  ;;  %v1092_v5 = vsel %vm1076_vm11, 1e+30, %v1038_v27  ;;  %v1093_v9 = vsel %vm1077_vm12, 1e+30, %v1039_v28  ;;  %v1101_v10 = vmin.f32 %v1085_v7, %v1089_v2 }
 0x1bf   : > { %v1094_v42 = vsel %vm1078_vm13, 1e+30, %v1040_v16  ;;  %v1095_v61 = vsel %vm1079_vm14, 1e+30, %v1041_v36  ;;  %v1096_v11 = vsel %vm1080_vm15, 1e+30, %v1042_v37  ;;  %v1102_v1 = vmin.f32 %v1086_v38, %v1090_v4 }
 0x1c0   : > { %v1097_v44 = vsel %vm1081_vm1, 1e+30, %v1043_v45  ;;  %v1098_v15 = vsel %vm1082_vm2, 1e+30, %v1044_v46  ;;  %v1099_v17 = vsel %vm1083_vm3, 1e+30, %v1045_v47  ;;  %v1103_v18 = vmin.f32 %v1087_v58, %v1091_v22 }
 0x1c1   : > { %v1100_v6 = vsel %vm1084_vm4, 1e+30, %v1046_v50  ;;  %v1104_v19 = vmin.f32 %v1088_v59, %v1092_v5  ;;  %v1105_v24 = vmin.f32 %v1101_v10, %v1093_v9  ;;  %v1106_v25 = vmin.f32 %v1102_v1, %v1094_v42 }
 0x1c2   : > { %v1107_v27 = vmin.f32 %v1103_v18, %v1095_v61  ;;  %v773_v37 = vrot.slane %v1980_v14, 4  ;;  %vm2352_vm5 = vcmask 23552   ;;  %v300_v7 = vmul.f32 %v2159_v8, %v2159_v8 }
 0x1c3   : > { %v1108_v28 = vmin.f32 %v1104_v19, %v1096_v11  ;;  %v1109_v29 = vmin.f32 %v1105_v24, %v1097_v44  ;;  %v1110_v16 = vmin.f32 %v1106_v25, %v1098_v15  ;;  %vm2353_vm0 = vmmov %vm2352_vm5  ;;  %v302_v38 = vmul.f32 %v2168_v13, %v2168_v13 }
 0x1c4   : > { %v1111_v36 = vmin.f32 %v1107_v27, %v1099_v17  ;;  %v774_v46 = vadd.f32 %v773_v37, %v1980_v14  ;;  %v311_v14 = vsel %vm2352_vm5, %v293_v53, 0.0  ;;  %v317_v48 = vsel %vm2353_vm0, %v295_v30, 0.0  ;;  %vm2354_vm6 = vmmov %vm2353_vm0 }
 0x1c5   : > { %v1112_v40 = vmin.f32 %v1108_v28, %v1100_v6  ;;  %v1113_v49 = vmin.f32 %v1109_v29, %v1110_v16  ;;  %v323_v12 = vsel %vm2354_vm6, %v297_v55, 0.0  ;;  %vm2355_vm7 = vmmov %vm2353_vm0  ;;  %v304_v58 = vmul.f32 %v2176_v20, %v2176_v20 }
 0x1c6   : > { %v775_v33 = vrot.slane %v774_v46, 2  ;;  %v329_v57 = vsel %vm2355_vm7, %v299_v31, 0.0  ;;  %vm2356_vm8 = vmmov %vm2353_vm0  ;;  %vm1152_vm1 = vcmp.eq.s32.totalorder %v1809_v63, 0  ;;  %vm1154_vm2 = vcmask 0  }
 0x1c7   : > { %v1114_v45 = vmin.f32 %v1111_v36, %v1112_v40  ;;  %v332_v60 = vsel %vm2356_vm8, %v300_v7, 0.0  ;;  %vm2357_vm9 = vmmov %vm2353_vm0 }
 0x1c8   : > { %v776_v21 = vadd.f32 %v775_v33, %v774_v46  ;;  %v338_v56 = vsel %vm2357_vm9, %v302_v38, 0.0  ;;  %vm2358_vm10 = vmmov %vm2353_vm0  ;;  %v307_v33 = vmul.f32 %v2196_v23, %v2196_v23 }
 0x1c9   : > { %v1115_v26 = vmin.f32 %v1113_v49, %v1114_v45  ;;  %v344_v3 = vsel %vm2358_vm10, %v304_v58, 0.0  ;;  %vm2359_vm11 = vmmov %vm2353_vm0 }
 0x1ca   : > { %v777_v39 = vrot.slane %v776_v21, 1  ;;  %vm2360_vm12 = vmmov %vm2353_vm0 }
 0x1cb   : > { %v1116_v47 = vrot.slane %v1115_v26, 4 }
 0x1cc   : > { %v2295_v0 = vadd.f32 %v777_v39, %v776_v21 }
 0x1cd   : > { %v1117_v34 = vmin.f32 %v1115_v26, %v1116_v47 }
 0x1cf   : > { %v1118_v50 = vrot.slane %v1117_v34, 2 }
 0x1d1   : > { %v1119_v35 = vmin.f32 %v1117_v34, %v1118_v50 }
 0x1d3   : > { %v1120_v43 = vrot.slane %v1119_v35, 1 }
 0x1d5   : > { %v1121_v62 = vmin.f32 %v1119_v35, %v1120_v43  ;;  %v353_v43 = vsel %vm2360_vm12, %v307_v33, 0.0 }
 0x1d7   : > { %v1122_v51 = vadd.f32 %v1121_v62, %v1068_v41  ;;  %v306_v41 = vmul.f32 %v2184_v32, %v2184_v32  ;;  %v310_v59 = vpop.xlane.xlu1 %309 }
 0x1d9   : > { %v1123_v52 = vmul.f32 0.2, %v1122_v51  ;;  %v350_v8 = vsel %vm2359_vm11, %v306_v41, 0.0 }
 0x1db   : > { %v2300_v54 = vadd.f32 %v1123_v52, %v2295_v0  ;;  %v316_v13 = vpop.xlane.xlu1 %315 }
 0x1dd   : > { %1125 = vadd.xlane.f32.xlu0 %v2300_v54 }
 0x1df   : > { %v322_v42 = vpop.xlane.xlu1 %321 }
 0x1e1   : > { %312 = vadd.xlane.f32.xlu0 %v311_v14 }
 0x1e5   : > { %318 = vadd.xlane.f32.xlu0 %v317_v48 }
 0x1e9   : > { %324 = vadd.xlane.f32.xlu0 %v323_v12 }
 0x1ed   : > { %330 = vadd.xlane.f32.xlu0 %v329_v57 }
 0x1f1   : > { %333 = vadd.xlane.f32.xlu0 %v332_v60 }
 0x1f2   : > { %v328_v19 = vpop.xlane.xlu1 %327 }
 0x1f5   : > { %339 = vadd.xlane.f32.xlu0 %v338_v56 }
 0x1f6   : > { %v337_v46 = vpop.xlane.xlu1 %336 }
 0x1f9   : > { %345 = vadd.xlane.f32.xlu0 %v344_v3 }
 0x1fa   : > { %v343_v21 = vpop.xlane.xlu1 %342 }
 0x1fd   : > { %351 = vadd.xlane.f32.xlu0 %v350_v8 }
 0x1fe   : > { %v349_v48 = vpop.xlane.xlu1 %348 }
 0x212   : > { %v1447_v2 = vpop.f32.mrb[0].mxu1 }
 0x213   : > { %v663_v4 = vpop.f32.mrb[1].mxu1  ;;  %v780_v35 = vmul.f32 2.0, %v1447_v2 }
 0x214   : > { %v779_v9 = vmul.f32 2.0, %v663_v4 }
 0x216   : > { %v795_v61 = vsub.f32 %v310_v59, %v779_v9 }
 0x238   : > { %v1450_v22 = vpop.f32.mrb[2].mxu1 }
 0x239   : > { %v673_v5 = vpop.f32.mrb[3].mxu1  ;;  %v782_v53 = vmul.f32 2.0, %v1450_v22 }
 0x23a   : > { %v781_v11 = vmul.f32 2.0, %v673_v5 }
 0x23c   : > { %v1453_v10 = vpop.f32.mrb[4].mxu1  ;;  %v797_v17 = vsub.f32 %v316_v13, %v781_v11 }
 0x23d   : > { %v683_v20 = vpop.f32.mrb[5].mxu1  ;;  %v784_v62 = vmul.f32 2.0, %v1453_v10 }
 0x23e   : > { %v783_v1 = vmul.f32 2.0, %v683_v20 }
 0x240   : > { %v799_v44 = vsub.f32 %v322_v42, %v783_v1  ;;  %v1456_v15 = vpop.f32.mrb[6].mxu1 }
 0x241   : > { %v693_v32 = vpop.f32.mrb[7].mxu1  ;;  %v786_v12 = vmul.f32 2.0, %v1456_v15 }
 0x242   : > { %v811_v18 = vmin.f32 %v795_v61, %v799_v44  ;;  %v785_v6 = vmul.f32 2.0, %v693_v32 }
 0x244   : > { %v801_v24 = vsub.f32 %v328_v19, %v785_v6  ;;  %v1459_v25 = vpop.f32.mrb[8].mxu1 }
 0x245   : > { %v703_v27 = vpop.f32.mrb[9].mxu1  ;;  %v788_v51 = vmul.f32 2.0, %v1459_v25 }
 0x246   : > { %v813_v28 = vmin.f32 %v797_v17, %v801_v24  ;;  %v787_v58 = vmul.f32 2.0, %v703_v27 }
 0x247   : > { %v804_v31 = vsub.f32 %v337_v46, %v788_v51 }
 0x248   : > { %v1462_v29 = vpop.f32.mrb[10].mxu1 }
 0x249   : > { %v713_v16 = vpop.f32.mrb[11].mxu1  ;;  %v790_v23 = vmul.f32 2.0, %v1462_v29 }
 0x24a   : > { %v789_v22 = vmul.f32 2.0, %v713_v16 }
 0x24b   : > { %v806_v3 = vsub.f32 %v343_v21, %v790_v23 }
 0x24c   : > { %v1465_v36 = vpop.f32.mrb[12].mxu1 }
 0x24d   : > { %v723_v37 = vpop.f32.mrb[13].mxu1  ;;  %v792_v14 = vmul.f32 2.0, %v1465_v36 }
 0x24e   : > { %v791_v42 = vmul.f32 2.0, %v723_v37 }
 0x24f   : > { %v808_v60 = vsub.f32 %v349_v48, %v792_v14 }
 0x250   : > { %v1468_v40 = vpop.f32.mrb[14].mxu1 }
 0x251   : > { %v733_v49 = vpop.f32.mrb[15].mxu1  ;;  %v794_v24 = vmul.f32 2.0, %v1468_v40 }
 0x252   : > { %v793_v1 = vmul.f32 2.0, %v733_v49 }
 0x26a   : > { %v1126_v45 = vpop.xlane.xlu0 %1125 }
 0x26b   : > { %v2325_v26 = vmul.f32 0.0078125, %v1126_v45 }
 0x26d   : > { %v1128_v47 = vsub.f32 %v2300_v54, %v2325_v26 }
 0x26e   : > { %v313_v34 = vpop.xlane.xlu0 %312 }
 0x26f   : > { %v1129_v50 = vmul.f32 %v1128_v47, %v1128_v47  ;;  %v796_v52 = vsub.f32 %v313_v34, %v780_v35 }
 0x271   : > { %1130 = vadd.xlane.f32.xlu1 %v1129_v50 }
 0x272   : > { %v319_v39 = vpop.xlane.xlu0 %318 }
 0x273   : > { %v798_v57 = vsub.f32 %v319_v39, %v782_v53 }
 0x275   : > { %354 = vadd.xlane.f32.xlu1 %v353_v43  ;;  %v1584_v43 = vmov 0.0  }
 0x276   : > { %v325_v30 = vpop.xlane.xlu0 %324 }
 0x277   : > { %v800_v55 = vsub.f32 %v325_v30, %v784_v62 }
 0x279   : > { %v812_v7 = vmin.f32 %v796_v52, %v800_v55 }
 0x27a   : > { %v331_v38 = vpop.xlane.xlu0 %330 }
 0x27b   : > { %v802_v56 = vsub.f32 %v331_v38, %v786_v12  ;;  %v816_v41 = vmin.f32 %v812_v7, %v804_v31 }
 0x27d   : > { %v814_v8 = vmin.f32 %v798_v57, %v802_v56  ;;  %v820_v59 = vmin.f32 %v816_v41, %v808_v60 }
 0x27e   : > { %v334_v2 = vpop.xlane.xlu0 %333 }
 0x27f   : > { %v803_v4 = vsub.f32 %v334_v2, %v787_v58  ;;  %v818_v13 = vmin.f32 %v814_v8, %v806_v3 }
 0x281   : > { %v815_v5 = vmin.f32 %v811_v18, %v803_v4 }
 0x282   : > { %v340_v9 = vpop.xlane.xlu0 %339 }
 0x283   : > { %v805_v10 = vsub.f32 %v340_v9, %v789_v22 }
 0x285   : > { %v817_v20 = vmin.f32 %v813_v28, %v805_v10 }
 0x286   : > { %v346_v61 = vpop.xlane.xlu0 %345 }
 0x287   : > { %v807_v11 = vsub.f32 %v346_v61, %v791_v42 }
 0x289   : > { %v819_v44 = vmin.f32 %v815_v5, %v807_v11 }
 0x28a   : > { %v352_v15 = vpop.xlane.xlu0 %351 }
 0x28b   : > { %v823_v32 = vmin.f32 %v819_v44, %v820_v59  ;;  %v809_v17 = vsub.f32 %v352_v15, %v793_v1 }
 0x28d   : > { %v821_v6 = vmin.f32 %v817_v20, %v809_v17 }
 0x2fe   : > { %v1131_v19 = vpop.xlane.xlu1 %1130 }
 0x2ff   : > { %v1132_v25 = vmul.f32 0.007874016, %v1131_v19 }
 0x301   : > { %1574 = vrsqrt.f32 %v1132_v25  ;;  %vm1135_vm13 = vcmp.eq.f32.partialorder %v1132_v25, inf  ;;  %v1138_v46 = vand.u32 2147483648, %v1132_v25  ;;  %vm1137_vm14 = vcmp.eq.f32.partialorder %v1132_v25, 0.0 }
 0x302   : > { %v355_v27 = vpop.xlane.xlu1 %354 }
 0x303   : > { %v810_v29 = vsub.f32 %v355_v27, %v794_v24 }
 0x305   : > { %v822_v16 = vmin.f32 %v818_v13, %v810_v29 }
 0x307   : > { %v824_v18 = vmin.f32 %v821_v6, %v822_v16 }
 0x309   : > { %v825_v36 = vmin.f32 %v823_v32, %v824_v18 }
 0x30b   : > { %v1575_v45 = vpop.eup %1574  ;;  %v826_v37 = vrot.slane %v825_v36, 4 }
 0x30c   : > { %v1134_v28 = vmul.f32 %v1575_v45, %v1132_v25 }
 0x30d   : > { %v827_v49 = vmin.f32 %v825_v36, %v826_v37 }
 0x30e   : > { %v1136_v47 = vsel %vm1135_vm13, %v1132_v25, %v1134_v28 }
 0x30f   : > { %v1139_v33 = vsel %vm1137_vm14, %v1138_v46, %v1136_v47  ;;  %v828_v34 = vrot.slane %v827_v49, 2 }
 0x310   : > { %v1140_v50 = vmul.f32 1.05, %v1139_v33 }
 0x311   : > { %v829_v21 = vmin.f32 %v827_v49, %v828_v34 }
 0x312   : > { %v1141_v40 = vadd.f32 %v1140_v50, %v2325_v26 }
 0x313   : > { %v830_v35 = vrot.slane %v829_v21, 1 }
 0x314   : > { %vm1142_vm15 = vcmp.gt.f32.partialorder %v2300_v54, %v1141_v40 }
 0x315   : > { %v1288_v39 = vsel %vm1142_vm15, 1.0, %v1584_v43  ;;  %v831_v62 = vmin.f32 %v829_v21, %v830_v35 }
 0x316   : > { %v1145_v51 = vmul.f32 %v1288_v39, %v2300_v54 }
 0x317   : > { %v832_v52 = vadd.f32 %v831_v62, %v2295_v0 }
 0x318   : > { %1146 = vadd.xlane.f32.xlu1 %v1145_v51 }
 0x319   : > { %833 = vadd.xlane.f32.xlu0 %v832_v52 }
 0x3a5   : > { %v1147_v53 = vpop.xlane.xlu1 %1146 }
 0x3a6   : > { %v1148_v14 = vmul.f32 0.0078125, %v1147_v53  ;;  %v834_v30 = vpop.xlane.xlu0 %833 }
 0x3a7   : > { %v836_v48 = vmul.f32 0.0078125, %v834_v30 }
 0x3a8   : > { %v1150_v55 = vmul.f32 3.0, %v1148_v14 }
 0x3a9   : > { %v1149_v12 = vmul.f32 5.0, %v836_v48 }
 0x3ab   : > { %v1151_v26 = vadd.f32 %v1150_v55, %v1149_v12 }
 0x3ad   : > { %v1153_v31 = vsel %vm1152_vm1, %v1151_v26, 0.0 }
 0x3ae   : > { %1155 = vst.msk [vmem:[%s159_s20] sm:$0x1] %vm1154_vm2, %v1153_v31 }
 0x3af PF: > { %s12_s9 = sadd.s32 1, %s1582_s9  }
 0x3b0   : > { %p9_p4 = scmp.ge.s32.totalorder %s12_s9, 4  }
 0x3b2   :  { %11 = sbr.rel (!%p9_p4) target bundleno = 1 (0x1), region = 61 }

</bundles_post_ra>
